<compile_context>
chip_gen: v6e
topology: v6e:2x2x1
jax: 0.10.0
libtpu: 0.0.40
codegen_flags: <defaults>
</compile_context>

<pallas_src>
import math

import jax
import jax.numpy as jnp
from jax.experimental import pallas as pl
from jax.experimental.pallas import tpu as pltpu


# ----------------------------------------------------------------------------- kernel


def _gt_kernel(cen_ref, nbed_ref, wcen_ref, bcen_ref, wne_ref, out_ref):
    """One grid step processes TB star graphs.

    cen_ref : (TB, D)        central node features
    nbed_ref: (N, TB, 2D)    per-neighbor-slot packed [neighbor | edge] features
    wcen_ref: (D, 2C)        packed [Ws | Wv]
    bcen_ref: (1, 2C)        packed [bs | bs + bv]   (f32)
    wne_ref : (2D, C)        stacked [Ws ; We]
    out_ref : (TB, (N+1)*C)  per-graph row = [central | nb_0 | ... | nb_{N-1}]
    """
    f32 = jnp.float32
    n_nb, _, _ = nbed_ref.shape
    c = wne_ref.shape[1]

    # Central path: one packed matmul x_c @ [Ws | Wv] + [bs | bs + bv].
    cen_pack = (jnp.dot(cen_ref[...], wcen_ref[...], preferred_element_type=f32)
                + bcen_ref[...])                       # (TB, 2C), f32
    nb_base = cen_pack[:, c:]                          # Wv x_c + bv + bs, (TB, C)

    # Central-node output occupies lanes [0, C) of the lane-dense output row.
    out_ref[:, 0:c] = cen_pack[:, :c].astype(out_ref.dtype)

    # Neighbor path: attention weight is exactly 1 (softmax over a single
    # incoming edge), so it is just a [Ws ; We] matmul plus the central message.
    wne = wne_ref[...]
    for n in range(n_nb):                              # static -> unrolled
        msg = jnp.dot(nbed_ref[n], wne, preferred_element_type=f32) + nb_base
        out_ref[:, (n + 1) * c:(n + 2) * c] = msg.astype(out_ref.dtype)


# ----------------------------------------------------------------------------- host-side packing / tiling


def pack_params(p, dtype=jnp.float32):
    """One-time packing: drop the dead q/k weights, fuse the two central-node
    projections into one [Ws | Wv] matmul, stack [Ws ; We] for the packed
    neighbor/edge stream.  `dtype` = MXU operand dtype (bf16 recommended on
    v5e/v6e/v7x for non-toy sizes); the bias stays f32 (added post-accumulate)."""
    return {
        "w_cen": jnp.concatenate([p["ws"], p["wv"]], axis=1).astype(dtype),     # (D, 2C)
        "b_cen": jnp.concatenate([p["bs"], p["bs"] + p["bv"]], axis=1)          # (1, 2C)
                   .astype(jnp.float32),
        "w_ne": jnp.concatenate([p["ws"], p["we"]], axis=0).astype(dtype),      # (2D, C)
    }


def pack_inputs(central, neighbor, edge, dtype=jnp.float32):
    """central (B,1,D), neighbor (B,N,D), edge (B,N,D) ->
         cen (B, D), nbed (N, B, 2D) in `dtype`.
    Ideally produced directly by the upstream data pipeline (no extra HBM pass);
    done here once on the host for a self-contained demo."""
    b, n, d = neighbor.shape
    cen = central.reshape(b, d).astype(dtype)
    nbed = jnp.transpose(jnp.concatenate([neighbor, edge], axis=-1),
                         (1, 0, 2)).astype(dtype)        # (N, B, 2D)
    return cen, nbed


def _padded_row_bytes(ncols, dtype):
    lanes = ((ncols + 127) // 128) * 128                 # lane padding in HBM/VMEM
    return lanes * jnp.dtype(dtype).itemsize


def _choose_tiling(batch, max_graphs_per_step, budget_graphs):
    """Graphs per grid step: as large as the VMEM budget / user cap allow,
    sublane-aligned (multiple of 8, required for blocked second-minor dims),
    keeping the grid >= 2 steps when the batch permits (both v7x TensorCores).
    Non-divisible batches are padded; garbage rows are dropped on the host."""
    tb = max(1, min(max_graphs_per_step, budget_graphs, pl.cdiv(batch, 2)))
    tb = ((tb + 7) // 8) * 8
    batch_pad = pl.cdiv(batch, tb) * tb
    return tb, batch_pad, batch_pad // tb


def graph_transformer_forward(central, neighbor, edge, packed, *,
                              activation_dtype=jnp.float32,
                              max_graphs_per_step=512,
                              block_vmem_budget_bytes=24 * 1024 * 1024,
                              vmem_limit_bytes=48 * 1024 * 1024):
    """central (B,1,D), neighbor (B,N,D), edge (B,N,D) -> (B*(N+1), C) f32.

    activation_dtype=bf16 halves input HBM traffic and feeds the bf16-native
    MXUs on v5e/v6e/v7x; accumulation is always f32.  The VMEM budget / limit
    defaults are safe on all three generations (v7x has only 64 MiB/TC)."""
    b, n_nb, d = neighbor.shape
    c = packed["w_ne"].shape[1]
    out_cols = (n_nb + 1) * c

    cen, nbed = pack_inputs(central, neighbor, edge, dtype=activation_dtype)
    d2 = nbed.shape[-1]

    # Per-graph padded VMEM bytes, double-buffered (inputs + output blocks).
    per_graph = 2 * (_padded_row_bytes(d, cen.dtype)
                     + n_nb * _padded_row_bytes(d2, nbed.dtype)
                     + _padded_row_bytes(out_cols, jnp.float32))
    budget_graphs = max(1, block_vmem_budget_bytes // per_graph)
    tb, b_pad, grid = _choose_tiling(b, max_graphs_per_step, budget_graphs)

    if b_pad != b:
        cen = jnp.pad(cen, ((0, b_pad - b), (0, 0)))
        nbed = jnp.pad(nbed, ((0, 0), (0, b_pad - b), (0, 0)))

    out = pl.pallas_call(
        _gt_kernel,
        out_shape=jax.ShapeDtypeStruct((b_pad, out_cols), jnp.float32),
        grid=(grid,),
        in_specs=[
            pl.BlockSpec((tb, d), lambda i: (i, 0)),               # central
            pl.BlockSpec((n_nb, tb, d2), lambda i: (0, i, 0)),     # [neighbor|edge]
            pl.BlockSpec(packed["w_cen"].shape, lambda i: (0, 0)), # [Ws | Wv]
            pl.BlockSpec(packed["b_cen"].shape, lambda i: (0, 0)), # [bs | bs+bv]
            pl.BlockSpec(packed["w_ne"].shape, lambda i: (0, 0)),  # [Ws ; We]
        ],
        out_specs=pl.BlockSpec((tb, out_cols), lambda i: (i, 0)),
        compiler_params=pltpu.CompilerParams(
            dimension_semantics=("parallel",),
            vmem_limit_bytes=vmem_limit_bytes),
    )(cen, nbed, packed["w_cen"], packed["b_cen"], packed["w_ne"])

    # (B, (N+1)*C) -> (B*(N+1), C) is a free row-major reinterpretation.
    return out[:b].reshape(b * (n_nb + 1), c)


# ----------------------------------------------------------------------------- reference & params


def _reference(central, neighbor, edge, p):
    """Pure-JAX reference of the full TransformerConv forward (including the
    attention/softmax path, which is a softmax over a singleton axis here and
    therefore provably 1 — the property the kernel exploits)."""
    b, n, d = neighbor.shape
    c = p["wq"].shape[1]
    x = jnp.concatenate([central, neighbor], axis=1)             # (B, N+1, D)
    skip = x @ p["ws"] + p["bs"][0]                              # (B, N+1, C)
    val_c = central[:, 0] @ p["wv"] + p["bv"][0]                 # (B, C)
    key_c = central[:, 0] @ p["wk"] + p["bk"][0]                 # (B, C)
    q_n = neighbor @ p["wq"] + p["bq"][0]                        # (B, N, C)
    e_proj = edge @ p["we"]                                      # (B, N, C)
    key = key_c[:, None, :] + e_proj
    score = jnp.sum(q_n * key, -1, keepdims=True) / math.sqrt(c)
    alpha = jax.nn.softmax(score, axis=-1)                       # singleton -> 1
    msg = (val_c[:, None, :] + e_proj) * alpha
    out = skip.at[:, 1:, :].add(msg)
    return out.reshape(b * (n + 1), c)


def init_params(key, node_dim, edge_dim, in_channels, out_channels):
    """Deterministic synthetic parameters matching TransformerConv's layers."""
    ks = jax.random.split(key, 8)
    s_in = 1.0 / math.sqrt(in_channels)
    s_e = 1.0 / math.sqrt(edge_dim)
    c = out_channels  # heads=1, concat=True
    return {
        "wq": jax.random.uniform(ks[0], (in_channels, c), jnp.float32, -s_in, s_in),
        "bq": jax.random.uniform(ks[1], (1, c), jnp.float32, -s_in, s_in),
        "wk": jax.random.uniform(ks[2], (in_channels, c), jnp.float32, -s_in, s_in),
        "bk": jax.random.uniform(ks[3], (1, c), jnp.float32, -s_in, s_in),
        "wv": jax.random.uniform(ks[4], (in_channels, c), jnp.float32, -s_in, s_in),
        "bv": jax.random.uniform(ks[5], (1, c), jnp.float32, -s_in, s_in),
        "we": jax.random.uniform(ks[6], (edge_dim, c), jnp.float32, -s_e, s_e),
        "ws": jax.random.uniform(ks[7], (in_channels, c), jnp.float32, -s_in, s_in),
        "bs": jnp.zeros((1, c), jnp.float32),
    }


# ----------------------------------------------------------------------------- demo


if __name__ == "__main__":
    D, C, N = 32, 32, 8      # node_dim = edge_dim = in_channels = D, out_channels = C
    key = jax.random.PRNGKey(0)
    k_param, k_data = jax.random.split(key)
    params = init_params(k_param, node_dim=D, edge_dim=D,
                         in_channels=D, out_channels=C)

    # (batch, activation dtype, max-abs-error tolerance vs f32 reference)
    configs = [
        (2,  jnp.float32, 3e-5),    # tiny batch: TB rounds up to 8, grid=1, padded
        (50, jnp.float32, 3e-5),    # non-divisible batch -> padding path, grid=2
        (96, jnp.float32, 3e-5),    # TB=48, grid=2
        (96, jnp.bfloat16, 1e-1),   # bf16 HBM storage / MXU operands, f32 accumulate
    ]
    for B, act_dtype, tol in configs:
        packed = pack_params(params, dtype=act_dtype)
        kc, kn, ke = jax.random.split(jax.random.fold_in(k_data, B), 3)
        central = jax.random.normal(kc, (B, 1, D), jnp.float32)
        neighbor = jax.random.normal(kn, (B, N, D), jnp.float32)
        edge = jax.random.normal(ke, (B, N, D), jnp.float32)

        out = jax.block_until_ready(
            graph_transformer_forward(central, neighbor, edge, packed,
                                      activation_dtype=act_dtype))
        ref = _reference(central, neighbor, edge, params)
        assert out.shape == (B * (N + 1), C), out.shape
        err = float(jnp.max(jnp.abs(out - ref)))
        assert err <= tol, (str(act_dtype), B, err)

    print("KERNEL_OK")
</pallas_src>

<mosaic_0001>
module attributes {stable_mosaic.version = 11 : i64} {
  func.func @_gt_kernel(%arg0: i32, %arg1: memref<8x32xf32, #tpu.memory_space<vmem>>, %arg2: memref<8x8x64xf32, #tpu.memory_space<vmem>>, %arg3: memref<32x64xf32, #tpu.memory_space<vmem>>, %arg4: memref<1x64xf32, #tpu.memory_space<vmem>>, %arg5: memref<64x32xf32, #tpu.memory_space<vmem>>, %arg6: memref<8x288xf32, #tpu.memory_space<vmem>>) attributes {dimension_semantics = [#tpu.dimension_semantics<parallel>], iteration_bounds = array<i64: 1>, scalar_prefetch = 0 : i64, scratch_operands = 0 : i64, tpu.core_type = #tpu.core_type<tc>, window_params = [{transform_indices = @transform_0, window_bounds = array<i64: 8, 32>}, {transform_indices = @transform_1, window_bounds = array<i64: 8, 8, 64>}, {pipeline_mode = #tpu.pipeline_mode<synchronous>, transform_indices = @transform_2, window_bounds = array<i64: 32, 64>}, {pipeline_mode = #tpu.pipeline_mode<synchronous>, transform_indices = @transform_3, window_bounds = array<i64: 1, 64>}, {pipeline_mode = #tpu.pipeline_mode<synchronous>, transform_indices = @transform_4, window_bounds = array<i64: 64, 32>}, {transform_indices = @transform_5, window_bounds = array<i64: 8, 288>}]} {
    %c0 = arith.constant 0 : index
    %c0_0 = arith.constant 0 : index
    %0 = vector.load %arg1[%c0, %c0_0] : memref<8x32xf32, #tpu.memory_space<vmem>>, vector<8x32xf32>
    %c0_1 = arith.constant 0 : index
    %c0_2 = arith.constant 0 : index
    %1 = vector.load %arg3[%c0_1, %c0_2] : memref<32x64xf32, #tpu.memory_space<vmem>>, vector<32x64xf32>
    %cst = arith.constant dense<0.000000e+00> : vector<8x64xf32>
    %2 = tpu.matmul %0, %1, %cst {dimension_numbers = #tpu.dot_dimension_numbers<[1], [0], [0], [1], [0, 0, 1, 1], [], []>} : vector<8x32xf32>, vector<32x64xf32>, vector<8x64xf32> -> vector<8x64xf32>
    %c0_3 = arith.constant 0 : index
    %c0_4 = arith.constant 0 : index
    %3 = vector.load %arg4[%c0_3, %c0_4] : memref<1x64xf32, #tpu.memory_space<vmem>>, vector<1x64xf32>
    %4 = vector.broadcast %3 : vector<1x64xf32> to vector<8x64xf32>
    %5 = arith.addf %2, %4 : vector<8x64xf32>
    %6 = vector.extract_strided_slice %5 {offsets = [0, 32], sizes = [8, 32], strides = [1, 1]} : vector<8x64xf32> to vector<8x32xf32>
    %7 = vector.extract_strided_slice %5 {offsets = [0, 0], sizes = [8, 32], strides = [1, 1]} : vector<8x64xf32> to vector<8x32xf32>
    %c0_5 = arith.constant 0 : index
    %c0_6 = arith.constant 0 : index
    %8 = vector.load %arg6[%c0_5, %c0_6] : memref<8x288xf32, #tpu.memory_space<vmem>>, vector<8x32xf32>
    tpu.vector_store %arg6[%c0_5, %c0_6], %7 {strides = array<i32>} : memref<8x288xf32, #tpu.memory_space<vmem>>, vector<8x32xf32>,
    %c0_7 = arith.constant 0 : index
    %c0_8 = arith.constant 0 : index
    %9 = vector.load %arg5[%c0_7, %c0_8] : memref<64x32xf32, #tpu.memory_space<vmem>>, vector<64x32xf32>
    %c0_9 = arith.constant 0 : index
    %c0_10 = arith.constant 0 : index
    %c0_11 = arith.constant 0 : index
    %10 = vector.load %arg2[%c0_9, %c0_10, %c0_11] : memref<8x8x64xf32, #tpu.memory_space<vmem>>, vector<1x8x64xf32>
    %11 = vector.shape_cast %10 : vector<1x8x64xf32> to vector<8x64xf32>
    %cst_12 = arith.constant dense<0.000000e+00> : vector<8x32xf32>
    %12 = tpu.matmul %11, %9, %cst_12 {dimension_numbers = #tpu.dot_dimension_numbers<[1], [0], [0], [1], [0, 0, 1, 1], [], []>} : vector<8x64xf32>, vector<64x32xf32>, vector<8x32xf32> -> vector<8x32xf32>
    %13 = arith.addf %12, %6 : vector<8x32xf32>
    %c0_13 = arith.constant 0 : index
    %c32 = arith.constant 32 : index
    %14 = vector.load %arg6[%c0_13, %c32] : memref<8x288xf32, #tpu.memory_space<vmem>>, vector<8x32xf32>
    tpu.vector_store %arg6[%c0_13, %c32], %13 {strides = array<i32>} : memref<8x288xf32, #tpu.memory_space<vmem>>, vector<8x32xf32>,
    %c1 = arith.constant 1 : index
    %c0_14 = arith.constant 0 : index
    %c0_15 = arith.constant 0 : index
    %15 = vector.load %arg2[%c1, %c0_14, %c0_15] : memref<8x8x64xf32, #tpu.memory_space<vmem>>, vector<1x8x64xf32>
    %16 = vector.shape_cast %15 : vector<1x8x64xf32> to vector<8x64xf32>
    %cst_16 = arith.constant dense<0.000000e+00> : vector<8x32xf32>
    %17 = tpu.matmul %16, %9, %cst_16 {dimension_numbers = #tpu.dot_dimension_numbers<[1], [0], [0], [1], [0, 0, 1, 1], [], []>} : vector<8x64xf32>, vector<64x32xf32>, vector<8x32xf32> -> vector<8x32xf32>
    %18 = arith.addf %17, %6 : vector<8x32xf32>
    %c0_17 = arith.constant 0 : index
    %c64 = arith.constant 64 : index
    %19 = vector.load %arg6[%c0_17, %c64] : memref<8x288xf32, #tpu.memory_space<vmem>>, vector<8x32xf32>
    tpu.vector_store %arg6[%c0_17, %c64], %18 {strides = array<i32>} : memref<8x288xf32, #tpu.memory_space<vmem>>, vector<8x32xf32>,
    %c2 = arith.constant 2 : index
    %c0_18 = arith.constant 0 : index
    %c0_19 = arith.constant 0 : index
    %20 = vector.load %arg2[%c2, %c0_18, %c0_19] : memref<8x8x64xf32, #tpu.memory_space<vmem>>, vector<1x8x64xf32>
    %21 = vector.shape_cast %20 : vector<1x8x64xf32> to vector<8x64xf32>
    %cst_20 = arith.constant dense<0.000000e+00> : vector<8x32xf32>
    %22 = tpu.matmul %21, %9, %cst_20 {dimension_numbers = #tpu.dot_dimension_numbers<[1], [0], [0], [1], [0, 0, 1, 1], [], []>} : vector<8x64xf32>, vector<64x32xf32>, vector<8x32xf32> -> vector<8x32xf32>
    %23 = arith.addf %22, %6 : vector<8x32xf32>
    %c0_21 = arith.constant 0 : index
    %c96 = arith.constant 96 : index
    %24 = vector.load %arg6[%c0_21, %c96] : memref<8x288xf32, #tpu.memory_space<vmem>>, vector<8x32xf32>
    tpu.vector_store %arg6[%c0_21, %c96], %23 {strides = array<i32>} : memref<8x288xf32, #tpu.memory_space<vmem>>, vector<8x32xf32>,
    %c3 = arith.constant 3 : index
    %c0_22 = arith.constant 0 : index
    %c0_23 = arith.constant 0 : index
    %25 = vector.load %arg2[%c3, %c0_22, %c0_23] : memref<8x8x64xf32, #tpu.memory_space<vmem>>, vector<1x8x64xf32>
    %26 = vector.shape_cast %25 : vector<1x8x64xf32> to vector<8x64xf32>
    %cst_24 = arith.constant dense<0.000000e+00> : vector<8x32xf32>
    %27 = tpu.matmul %26, %9, %cst_24 {dimension_numbers = #tpu.dot_dimension_numbers<[1], [0], [0], [1], [0, 0, 1, 1], [], []>} : vector<8x64xf32>, vector<64x32xf32>, vector<8x32xf32> -> vector<8x32xf32>
    %28 = arith.addf %27, %6 : vector<8x32xf32>
    %c0_25 = arith.constant 0 : index
    %c128 = arith.constant 128 : index
    %29 = vector.load %arg6[%c0_25, %c128] : memref<8x288xf32, #tpu.memory_space<vmem>>, vector<8x32xf32>
    tpu.vector_store %arg6[%c0_25, %c128], %28 {strides = array<i32>} : memref<8x288xf32, #tpu.memory_space<vmem>>, vector<8x32xf32>,
    %c4 = arith.constant 4 : index
    %c0_26 = arith.constant 0 : index
    %c0_27 = arith.constant 0 : index
    %30 = vector.load %arg2[%c4, %c0_26, %c0_27] : memref<8x8x64xf32, #tpu.memory_space<vmem>>, vector<1x8x64xf32>
    %31 = vector.shape_cast %30 : vector<1x8x64xf32> to vector<8x64xf32>
    %cst_28 = arith.constant dense<0.000000e+00> : vector<8x32xf32>
    %32 = tpu.matmul %31, %9, %cst_28 {dimension_numbers = #tpu.dot_dimension_numbers<[1], [0], [0], [1], [0, 0, 1, 1], [], []>} : vector<8x64xf32>, vector<64x32xf32>, vector<8x32xf32> -> vector<8x32xf32>
    %33 = arith.addf %32, %6 : vector<8x32xf32>
    %c0_29 = arith.constant 0 : index
    %c160 = arith.constant 160 : index
    %34 = vector.load %arg6[%c0_29, %c160] : memref<8x288xf32, #tpu.memory_space<vmem>>, vector<8x32xf32>
    tpu.vector_store %arg6[%c0_29, %c160], %33 {strides = array<i32>} : memref<8x288xf32, #tpu.memory_space<vmem>>, vector<8x32xf32>,
    %c5 = arith.constant 5 : index
    %c0_30 = arith.constant 0 : index
    %c0_31 = arith.constant 0 : index
    %35 = vector.load %arg2[%c5, %c0_30, %c0_31] : memref<8x8x64xf32, #tpu.memory_space<vmem>>, vector<1x8x64xf32>
    %36 = vector.shape_cast %35 : vector<1x8x64xf32> to vector<8x64xf32>
    %cst_32 = arith.constant dense<0.000000e+00> : vector<8x32xf32>
    %37 = tpu.matmul %36, %9, %cst_32 {dimension_numbers = #tpu.dot_dimension_numbers<[1], [0], [0], [1], [0, 0, 1, 1], [], []>} : vector<8x64xf32>, vector<64x32xf32>, vector<8x32xf32> -> vector<8x32xf32>
    %38 = arith.addf %37, %6 : vector<8x32xf32>
    %c0_33 = arith.constant 0 : index
    %c192 = arith.constant 192 : index
    %39 = vector.load %arg6[%c0_33, %c192] : memref<8x288xf32, #tpu.memory_space<vmem>>, vector<8x32xf32>
    tpu.vector_store %arg6[%c0_33, %c192], %38 {strides = array<i32>} : memref<8x288xf32, #tpu.memory_space<vmem>>, vector<8x32xf32>,
    %c6 = arith.constant 6 : index
    %c0_34 = arith.constant 0 : index
    %c0_35 = arith.constant 0 : index
    %40 = vector.load %arg2[%c6, %c0_34, %c0_35] : memref<8x8x64xf32, #tpu.memory_space<vmem>>, vector<1x8x64xf32>
    %41 = vector.shape_cast %40 : vector<1x8x64xf32> to vector<8x64xf32>
    %cst_36 = arith.constant dense<0.000000e+00> : vector<8x32xf32>
    %42 = tpu.matmul %41, %9, %cst_36 {dimension_numbers = #tpu.dot_dimension_numbers<[1], [0], [0], [1], [0, 0, 1, 1], [], []>} : vector<8x64xf32>, vector<64x32xf32>, vector<8x32xf32> -> vector<8x32xf32>
    %43 = arith.addf %42, %6 : vector<8x32xf32>
    %c0_37 = arith.constant 0 : index
    %c224 = arith.constant 224 : index
    %44 = vector.load %arg6[%c0_37, %c224] : memref<8x288xf32, #tpu.memory_space<vmem>>, vector<8x32xf32>
    tpu.vector_store %arg6[%c0_37, %c224], %43 {strides = array<i32>} : memref<8x288xf32, #tpu.memory_space<vmem>>, vector<8x32xf32>,
    %c7 = arith.constant 7 : index
    %c0_38 = arith.constant 0 : index
    %c0_39 = arith.constant 0 : index
    %45 = vector.load %arg2[%c7, %c0_38, %c0_39] : memref<8x8x64xf32, #tpu.memory_space<vmem>>, vector<1x8x64xf32>
    %46 = vector.shape_cast %45 : vector<1x8x64xf32> to vector<8x64xf32>
    %cst_40 = arith.constant dense<0.000000e+00> : vector<8x32xf32>
    %47 = tpu.matmul %46, %9, %cst_40 {dimension_numbers = #tpu.dot_dimension_numbers<[1], [0], [0], [1], [0, 0, 1, 1], [], []>} : vector<8x64xf32>, vector<64x32xf32>, vector<8x32xf32> -> vector<8x32xf32>
    %48 = arith.addf %47, %6 : vector<8x32xf32>
    %c0_41 = arith.constant 0 : index
    %c256 = arith.constant 256 : index
    %49 = vector.load %arg6[%c0_41, %c256] : memref<8x288xf32, #tpu.memory_space<vmem>>, vector<8x32xf32>
    tpu.vector_store %arg6[%c0_41, %c256], %48 {strides = array<i32>} : memref<8x288xf32, #tpu.memory_space<vmem>>, vector<8x32xf32>,
    return
  }
  func.func @transform_0(%arg0: i32) -> (i32, i32) {
    %c0_i32 = arith.constant 0 : i32
    %c0_i32_0 = arith.constant 0 : i32
    return %arg0, %c0_i32 : i32, i32
  }
  func.func @transform_1(%arg0: i32) -> (i32, i32, i32) {
    %c0_i32 = arith.constant 0 : i32
    %c0_i32_0 = arith.constant 0 : i32
    %c0_i32_1 = arith.constant 0 : i32
    return %c0_i32, %arg0, %c0_i32_0 : i32, i32, i32
  }
  func.func @transform_2(%arg0: i32) -> (i32, i32) {
    %c0_i32 = arith.constant 0 : i32
    %c0_i32_0 = arith.constant 0 : i32
    %c0_i32_1 = arith.constant 0 : i32
    return %c0_i32, %c0_i32_0 : i32, i32
  }
  func.func @transform_3(%arg0: i32) -> (i32, i32) {
    %c0_i32 = arith.constant 0 : i32
    %c0_i32_0 = arith.constant 0 : i32
    %c0_i32_1 = arith.constant 0 : i32
    return %c0_i32, %c0_i32_0 : i32, i32
  }
  func.func @transform_4(%arg0: i32) -> (i32, i32) {
    %c0_i32 = arith.constant 0 : i32
    %c0_i32_0 = arith.constant 0 : i32
    %c0_i32_1 = arith.constant 0 : i32
    return %c0_i32, %c0_i32_0 : i32, i32
  }
  func.func @transform_5(%arg0: i32) -> (i32, i32) {
    %c0_i32 = arith.constant 0 : i32
    %c0_i32_0 = arith.constant 0 : i32
    return %arg0, %c0_i32 : i32, i32
  }
}

</mosaic_0001>

<bundles_post_ra>
// kernel: tpu_custom_call.1
= control target key start
LH: loop header
LB: loop body
LE: loop exit
PB: predicated region body
PF: predicated region fallthrough
CT: control target
= control target key end

     0   :  { %10 = vsyncpa [#allocation3], 0  ;;  %s1377_s0 = inlined_call_operand.hbm [shape: f32[8,32], index: 0, kind: input, shape index: {}]   ;;  %s1378_s1 = inlined_call_operand.vmem [shape: f32[8,8,64], index: 1, kind: input, shape index: {}]   ;;  %s1379_s2 = inlined_call_operand.vmem [shape: f32[32,64], index: 2, kind: input, shape index: {}]   ;;  %s1380_s3 = inlined_call_operand.vmem [shape: f32[1,64], index: 3, kind: input, shape index: {}]   ;;  %s1381_s4 = inlined_call_operand.vmem [shape: f32[64,32], index: 4, kind: input, shape index: {}]   ;;  %s1382_s5 = inlined_call_operand.hbm [shape: f32[8,288], index: 5, kind: output, shape index: {}]  }
   0x1   :  { %11 = vsyncpa [#allocation4], 0  ;;  %s1090_s18 = smov [#allocation2]  }
   0x2   :  { %s18_s19 = sshll.u32 %s1090_s18, 4  ;;  %s19_s19 = int_to_ptr.vmem [resolvable:$true] %s18_s19 }
   0x3   :  { %s1054_s20 = scalar_lea.vmem %s19_s19, 128  ;;  %p1059_p1 = scmp.lt.s32.totalorder %s19_s19, %s19_s19 }
   0x4   :  { %p1055_p0 = scmp.ne.s32.totalorder %s19_s19, %s1054_s20  ;;  %p1060_p2 = scmp.lt.s32.totalorder %s1054_s20, %s1054_s20 }
   0x6   :  { %p1061_p3 = por %p1060_p2, %p1059_p1 }
   0x8   :  { %p1062_p4 = pnand %p1061_p3, %p1055_p0 }
   0xa   :  { %1065 = shalt.err (!%p1062_p4)
}
   0xb   :  { %21 = dma.hbm_to_vmem [thread:$0]  %s1377_s0, 128, %s19_s19, [#allocation3]  }
   0xc   :  { %1086 = dma.done.wait [#allocation3], 128  }
   0xd   :  { %1087 = vsyncadd [#allocation3], 4294967168  ;;  %v1091_v0 = vmov 0.0   ;;  %vm1092_vm0 = vmmov 0   ;;  %v37_v1 = vld [vmem:[%s1379_s2 + $0x18] sm:$0xff]  ;;  %v36_v2 = vld [vmem:[%s1379_s2 + $0x10] sm:$0xff] }
   0xe   :  { %876 = vmatprep.subr.mxu0 %v1091_v0  ;;  %884 = vmatprep.mubr.msk.f32.mxu0 %vm1092_vm0, %v1091_v0  ;;  %v1145_v3 = vld [vmem:[%s1381_s4 + $0x38] sm:$0xff]  ;;  %v35_v4 = vld [vmem:[%s1379_s2 + $0x8] sm:$0xff]  ;;  %v1155_v5 = vld [vmem:[%s1381_s4 + $0x30] sm:$0xff]  ;;  %vm45_vm1 = vcmask 261120   ;;  %vm133_vm2 = vcmask 523264   ;;  %s1095_s11 = smov 64  }
   0xf   :  { %887 = vmatprep.subr.mxu1 %v1091_v0  ;;  %903 = vmatprep.mubr.msk.f32.mxu1 %vm1092_vm0, %v1091_v0  ;;  %v1161_v6 = vld [vmem:[%s1381_s4 + $0x28] sm:$0xff]  ;;  %v34_v7 = vld [vmem:[%s1379_s2] sm:$0xff]  ;;  %v1182_v10 = vld [vmem:[%s1381_s4 + $0x18] sm:$0xff]  ;;  %vm211_vm3 = vcmask 523520   ;;  %vm292_vm4 = vcmask 785920   ;;  %s1096_s12 = smov [#allocation5]  }
  0x10   :  { %877 = vmatpush3.msra.mxu0 %v37_v1  ;;  %888 = vmatpush3.msra.mxu1 %v1145_v3  ;;  %v33_v8 = vld [vmem:[#allocation2] sm:$0xff]  ;;  %v1191_v11 = vld [vmem:[%s1381_s4 + $0x10] sm:$0xff]  ;;  %v1200_v12 = vld [vmem:[%s1381_s4 + $0x8] sm:$0xff]  ;;  %s773_s2 = sshll.u32 %s1096_s12, 4  ;;  %vm373_vm5 = vcmask 1048320   ;;  %s774_s2 = int_to_ptr.vmem [resolvable:$true] %s773_s2 }
  0x11   :  { %878 = vmatprep.subr.mxu0 %v1091_v0  ;;  %889 = vmatprep.subr.mxu1 %v1091_v0  ;;  %v1174_v9 = vld [vmem:[%s1381_s4 + $0x20] sm:$0xff]  ;;  %v785_v15 = vld [vmem:[%s1378_s1 + $0x8] sm:$0xff]  ;;  %v787_v16 = vld [vmem:[%s1378_s1 + $0x10] sm:$0xff]  ;;  %s1066_s13 = scalar_lea.vmem %s774_s2, 384  ;;  %p1071_p6 = scmp.lt.s32.totalorder %s774_s2, %s774_s2 }
  0x12   :  { %879 = vmatpush3.msra.mxu0 %v36_v2  ;;  %890 = vmatpush3.msra.mxu1 %v1155_v5  ;;  %v1209_v13 = vld [vmem:[%s1381_s4] sm:$0xff]  ;;  %v789_v17 = vld [vmem:[%s1378_s1 + $0x18] sm:$0xff]  ;;  %v793_v19 = vld [vmem:[%s1378_s1 + $0x28] sm:$0xff]  ;;  %p1067_p5 = scmp.ne.s32.totalorder %s774_s2, %s1066_s13  ;;  %p1072_p7 = scmp.lt.s32.totalorder %s1066_s13, %s1066_s13 }
  0x13   :  { %880 = vmatprep.subr.mxu0 %v1091_v0  ;;  %891 = vmatprep.subr.mxu1 %v1091_v0  ;;  %v128_v14 = vld [vmem:[%s1378_s1] sm:$0xff]  ;;  %v795_v20 = vld [vmem:[%s1378_s1 + $0x30] sm:$0xff]  ;;  %v797_v21 = vld [vmem:[%s1378_s1 + $0x38] sm:$0xff] }
  0x14   :  { %881 = vmatpush3.msra.mxu0 %v35_v4  ;;  %892 = vmatpush3.msra.mxu1 %v1161_v6  ;;  %v791_v18 = vld [vmem:[%s1378_s1 + $0x20] sm:$0xff]  ;;  %s1093_s1 = smov 96   ;;  %p1073_p8 = por %p1072_p7, %p1071_p6 }
  0x15   :  { %882 = vmatprep.subr.mxu0 %v1091_v0  ;;  %893 = vmatprep.subr.mxu1 %v1091_v0  ;;  %v782_v22 = vld [vmem:[%s1380_s3] ss:$0 sm:$0xff]  ;;  %s1094_s3 = smov 32  }
  0x16   :  { %883 = vmatpush3.msra.mxu0 %v34_v7  ;;  %894 = vmatpush3.msra.mxu1 %v1174_v9  ;;  %p1074_p9 = pnand %p1073_p8, %p1067_p5 }
  0x17   :  { %885 = vmatmul.mubr.msk.f32.vlgmr.msra.gmra.mxu0 %vm45_vm1, %v33_v8  ;;  %906 = vmatprep.subr.mxu0 %v1091_v0 }
  0x18   :  { %907 = vmatpush3.msra.mxu0 %v1145_v3  ;;  %895 = vmatprep.subr.mxu1 %v1091_v0 }
  0x19   :  { %908 = vmatprep.subr.mxu0 %v1091_v0  ;;  %896 = vmatpush3.msra.mxu1 %v1182_v10 }
  0x1a   :  { %909 = vmatpush3.msra.mxu0 %v1155_v5  ;;  %897 = vmatprep.subr.mxu1 %v1091_v0 }
  0x1b   :  { %910 = vmatprep.subr.mxu0 %v1091_v0  ;;  %898 = vmatpush3.msra.mxu1 %v1191_v11 }
  0x1c   :  { %911 = vmatpush3.msra.mxu0 %v1161_v6  ;;  %899 = vmatprep.subr.mxu1 %v1091_v0 }
  0x1d   :  { %912 = vmatprep.subr.mxu0 %v1091_v0  ;;  %900 = vmatpush3.msra.mxu1 %v1200_v12 }
  0x1e   :  { %913 = vmatpush3.msra.mxu0 %v1174_v9  ;;  %901 = vmatprep.subr.mxu1 %v1091_v0 }
  0x1f   :  { %914 = vmatprep.subr.mxu0 %v1091_v0  ;;  %902 = vmatpush3.msra.mxu1 %v1209_v13 }
  0x20   :  { %915 = vmatpush3.msra.mxu0 %v1182_v10  ;;  %922 = vmatprep.mubr.msk.f32.mxu0 %vm1092_vm0, %v1091_v0 }
  0x21   :  { %916 = vmatprep.subr.mxu0 %v1091_v0  ;;  %925 = vmatprep.subr.mxu1 %v1091_v0 }
  0x22   :  { %917 = vmatpush3.msra.mxu0 %v1191_v11  ;;  %904 = vmatmul.mubr.msk.f32.vlgmr.msra.gmra.mxu1 %vm133_vm2, %v128_v14 }
  0x23   :  { %918 = vmatprep.subr.mxu0 %v1091_v0  ;;  %926 = vmatpush3.msra.mxu1 %v1145_v3 }
  0x24   :  { %919 = vmatpush3.msra.mxu0 %v1200_v12  ;;  %927 = vmatprep.subr.mxu1 %v1091_v0 }
  0x25   :  { %920 = vmatprep.subr.mxu0 %v1091_v0  ;;  %928 = vmatpush3.msra.mxu1 %v1155_v5 }
  0x26   :  { %921 = vmatpush3.msra.mxu0 %v1209_v13  ;;  %929 = vmatprep.subr.mxu1 %v1091_v0 }
  0x27   :  { %944 = vmatprep.subr.mxu0 %v1091_v0  ;;  %923 = vmatmul.mubr.msk.f32.vlgmr.msra.gmra.mxu0 %vm133_vm2, %v785_v15 }
  0x28   :  { %945 = vmatpush3.msra.mxu0 %v1145_v3  ;;  %930 = vmatpush3.msra.mxu1 %v1161_v6 }
  0x29   :  { %946 = vmatprep.subr.mxu0 %v1091_v0  ;;  %931 = vmatprep.subr.mxu1 %v1091_v0 }
  0x2a   :  { %947 = vmatpush3.msra.mxu0 %v1155_v5  ;;  %932 = vmatpush3.msra.mxu1 %v1174_v9 }
  0x2b   :  { %948 = vmatprep.subr.mxu0 %v1091_v0  ;;  %933 = vmatprep.subr.mxu1 %v1091_v0 }
  0x2c   :  { %949 = vmatpush3.msra.mxu0 %v1161_v6  ;;  %934 = vmatpush3.msra.mxu1 %v1182_v10 }
  0x2d   :  { %950 = vmatprep.subr.mxu0 %v1091_v0  ;;  %935 = vmatprep.subr.mxu1 %v1091_v0 }
  0x2e   :  { %951 = vmatpush3.msra.mxu0 %v1174_v9  ;;  %936 = vmatpush3.msra.mxu1 %v1191_v11 }
  0x2f   :  { %952 = vmatprep.subr.mxu0 %v1091_v0  ;;  %937 = vmatprep.subr.mxu1 %v1091_v0 }
  0x30   :  { %953 = vmatpush3.msra.mxu0 %v1182_v10  ;;  %938 = vmatpush3.msra.mxu1 %v1200_v12 }
  0x31   :  { %954 = vmatprep.subr.mxu0 %v1091_v0  ;;  %939 = vmatprep.subr.mxu1 %v1091_v0 }
  0x32   :  { %955 = vmatpush3.msra.mxu0 %v1191_v11  ;;  %940 = vmatpush3.msra.mxu1 %v1209_v13 }
  0x33   :  { %956 = vmatprep.subr.mxu0 %v1091_v0  ;;  %941 = vmatprep.mubr.msk.f32.mxu1 %vm1092_vm0, %v1091_v0 }
  0x34   :  { %957 = vmatpush3.msra.mxu0 %v1200_v12  ;;  %960 = vmatprep.mubr.msk.f32.mxu0 %vm1092_vm0, %v1091_v0 }
  0x35   :  { %958 = vmatprep.subr.mxu0 %v1091_v0  ;;  %963 = vmatprep.subr.mxu1 %v1091_v0 }
  0x36   :  { %959 = vmatpush3.msra.mxu0 %v1209_v13  ;;  %942 = vmatmul.mubr.msk.f32.vlgmr.msra.gmra.mxu1 %vm133_vm2, %v787_v16 }
  0x37   :  { %982 = vmatprep.subr.mxu0 %v1091_v0  ;;  %961 = vmatmul.mubr.msk.f32.vlgmr.msra.gmra.mxu0 %vm133_vm2, %v789_v17 }
  0x38   :  { %964 = vmatpush3.msra.mxu1 %v1145_v3  ;;  %983 = vmatpush3.msra.mxu0 %v1145_v3 }
  0x39   :  { %965 = vmatprep.subr.mxu1 %v1091_v0  ;;  %984 = vmatprep.subr.mxu0 %v1091_v0 }
  0x3a   :  { %966 = vmatpush3.msra.mxu1 %v1155_v5  ;;  %985 = vmatpush3.msra.mxu0 %v1155_v5 }
  0x3b   :  { %967 = vmatprep.subr.mxu1 %v1091_v0  ;;  %986 = vmatprep.subr.mxu0 %v1091_v0 }
  0x3c   :  { %968 = vmatpush3.msra.mxu1 %v1161_v6  ;;  %987 = vmatpush3.msra.mxu0 %v1161_v6 }
  0x3d   :  { %969 = vmatprep.subr.mxu1 %v1091_v0  ;;  %988 = vmatprep.subr.mxu0 %v1091_v0 }
  0x3e   :  { %970 = vmatpush3.msra.mxu1 %v1174_v9  ;;  %989 = vmatpush3.msra.mxu0 %v1174_v9 }
  0x3f   :  { %971 = vmatprep.subr.mxu1 %v1091_v0  ;;  %990 = vmatprep.subr.mxu0 %v1091_v0 }
  0x40   :  { %972 = vmatpush3.msra.mxu1 %v1182_v10  ;;  %991 = vmatpush3.msra.mxu0 %v1182_v10 }
  0x41   :  { %973 = vmatprep.subr.mxu1 %v1091_v0  ;;  %992 = vmatprep.subr.mxu0 %v1091_v0 }
  0x42   :  { %974 = vmatpush3.msra.mxu1 %v1191_v11  ;;  %993 = vmatpush3.msra.mxu0 %v1191_v11 }
  0x43   :  { %975 = vmatprep.subr.mxu1 %v1091_v0  ;;  %994 = vmatprep.subr.mxu0 %v1091_v0 }
  0x44   :  { %976 = vmatpush3.msra.mxu1 %v1200_v12  ;;  %995 = vmatpush3.msra.mxu0 %v1200_v12 }
  0x45   :  { %977 = vmatprep.subr.mxu1 %v1091_v0  ;;  %996 = vmatprep.subr.mxu0 %v1091_v0 }
  0x46   :  { %978 = vmatpush3.msra.mxu1 %v1209_v13  ;;  %997 = vmatpush3.msra.mxu0 %v1209_v13 }
  0x47   :  { %979 = vmatprep.mubr.msk.f32.mxu1 %vm1092_vm0, %v1091_v0  ;;  %998 = vmatprep.mubr.msk.f32.mxu0 %vm1092_vm0, %v1091_v0 }
  0x48   :  { %1001 = vmatprep.subr.mxu1 %v1091_v0  ;;  %1020 = vmatprep.subr.mxu0 %v1091_v0 }
  0x49   :  { %980 = vmatmul.mubr.msk.f32.vlgmr.msra.gmra.mxu1 %vm133_vm2, %v791_v18  ;;  %999 = vmatmul.mubr.msk.f32.vlgmr.msra.gmra.mxu0 %vm133_vm2, %v793_v19 }
  0x4a   :  { %1002 = vmatpush3.msra.mxu1 %v1145_v3  ;;  %1021 = vmatpush3.msra.mxu0 %v1145_v3 }
  0x4b   :  { %1003 = vmatprep.subr.mxu1 %v1091_v0  ;;  %1022 = vmatprep.subr.mxu0 %v1091_v0 }
  0x4c   :  { %1004 = vmatpush3.msra.mxu1 %v1155_v5  ;;  %1023 = vmatpush3.msra.mxu0 %v1155_v5 }
  0x4d   :  { %1005 = vmatprep.subr.mxu1 %v1091_v0  ;;  %1024 = vmatprep.subr.mxu0 %v1091_v0 }
  0x4e   :  { %1006 = vmatpush3.msra.mxu1 %v1161_v6  ;;  %1025 = vmatpush3.msra.mxu0 %v1161_v6 }
  0x4f   :  { %1007 = vmatprep.subr.mxu1 %v1091_v0  ;;  %1026 = vmatprep.subr.mxu0 %v1091_v0 }
  0x50   :  { %1008 = vmatpush3.msra.mxu1 %v1174_v9  ;;  %1027 = vmatpush3.msra.mxu0 %v1174_v9 }
  0x51   :  { %1009 = vmatprep.subr.mxu1 %v1091_v0  ;;  %1028 = vmatprep.subr.mxu0 %v1091_v0 }
  0x52   :  { %1010 = vmatpush3.msra.mxu1 %v1182_v10  ;;  %1029 = vmatpush3.msra.mxu0 %v1182_v10 }
  0x53   :  { %1011 = vmatprep.subr.mxu1 %v1091_v0  ;;  %1030 = vmatprep.subr.mxu0 %v1091_v0 }
  0x54   :  { %1012 = vmatpush3.msra.mxu1 %v1191_v11  ;;  %1031 = vmatpush3.msra.mxu0 %v1191_v11 }
  0x55   :  { %1013 = vmatprep.subr.mxu1 %v1091_v0  ;;  %1032 = vmatprep.subr.mxu0 %v1091_v0 }
  0x56   :  { %1014 = vmatpush3.msra.mxu1 %v1200_v12  ;;  %1033 = vmatpush3.msra.mxu0 %v1200_v12 }
  0x57   :  { %1015 = vmatprep.subr.mxu1 %v1091_v0  ;;  %1034 = vmatprep.subr.mxu0 %v1091_v0 }
  0x58   :  { %1016 = vmatpush3.msra.mxu1 %v1209_v13  ;;  %1017 = vmatprep.mubr.msk.f32.mxu1 %vm1092_vm0, %v1091_v0 }
  0x59   :  { %1035 = vmatpush3.msra.mxu0 %v1209_v13  ;;  %1036 = vmatprep.mubr.msk.f32.mxu0 %vm1092_vm0, %v1091_v0 }
  0x5a   :  { %1018 = vmatmul.mubr.msk.f32.vlgmr.msra.gmra.mxu1 %vm133_vm2, %v795_v20  ;;  %1037 = vmatmul.mubr.msk.f32.vlgmr.msra.gmra.mxu0 %vm133_vm2, %v797_v21 }
  0xd7   :  { %v115_v23 = vpop.f32.mrf.mxu0 }
  0xd8   :  { %v116_v24 = vadd.f32 %v782_v22, %v115_v23 }
  0xd9   :  { %v886_v25 = vpop.f32.mrf.mxu0 }
  0xda   :  { %119 = vst.msk [vmem:[#allocation5] sm:$0xff] %vm45_vm1, %v116_v24  ;;  %130 = vrot.lane.b32.xlu0 %v116_v24, %s1093_s1 }
  0xe2   :  { %v203_v26 = vpop.f32.mrf.mxu1 }
  0xe4   :  { %v905_v27 = vpop.f32.mrf.mxu1 }
  0xe7   :  { %v284_v28 = vpop.f32.mrf.mxu0 }
  0xe9   :  { %v924_v29 = vpop.f32.mrf.mxu0 }
  0xf6   :  { %v365_v30 = vpop.f32.mrf.mxu1 }
  0xf7   :  { %v446_v31 = vpop.f32.mrf.mxu0 }
  0xf8   :  { %v943_v32 = vpop.f32.mrf.mxu1 }
  0xf9   :  { %v962_v33 = vpop.f32.mrf.mxu0 }
 0x109   :  { %v522_v34 = vpop.f32.mrf.mxu1  ;;  %v602_v35 = vpop.f32.mrf.mxu0 }
 0x10b   :  { %v981_v36 = vpop.f32.mrf.mxu1  ;;  %v1000_v37 = vpop.f32.mrf.mxu0 }
 0x11a   :  { %v682_v38 = vpop.f32.mrf.mxu1  ;;  %v762_v39 = vpop.f32.mrf.mxu0 }
 0x11c   :  { %v1019_v40 = vpop.f32.mrf.mxu1  ;;  %v1038_v41 = vpop.f32.mrf.mxu0 }
 0x14c   :  { %v131_v42 = vpop.permute.xlu0 %130 }
 0x14d   :  { %v763_v43 = vadd.f32 %v762_v39, %v131_v42  ;;  %v523_v44 = vadd.f32 %v522_v34, %v131_v42  ;;  %v204_v45 = vadd.f32 %v203_v26, %v131_v42  ;;  %v447_v46 = vadd.f32 %v446_v31, %v131_v42 }
 0x14e   :  { %v285_v47 = vadd.f32 %v284_v28, %v131_v42  ;;  %v603_v48 = vadd.f32 %v602_v35, %v131_v42  ;;  %v366_v49 = vadd.f32 %v365_v30, %v131_v42  ;;  %v683_v50 = vadd.f32 %v682_v38, %v131_v42 }
 0x14f   :  { %766 = vst.msk [vmem:[#allocation5 + $0x10] sm:$0xff] %vm45_vm1, %v763_v43  ;;  %527 = vrot.lane.b32.xlu1 %v523_v44, %s1094_s3  ;;  %208 = vrot.lane.b32.xlu0 %v204_v45, %s1094_s3  ;;  %450 = vst.msk [vmem:[#allocation5 + $0x8] sm:$0xff] %vm45_vm1, %v447_v46 }
 0x153   :  { %289 = vrot.lane.b32.xlu1 %v285_v47, %s1095_s11  ;;  %607 = vrot.lane.b32.xlu0 %v603_v48, %s1095_s11 }
 0x157   :  { %370 = vrot.lane.b32.xlu1 %v366_v49, %s1093_s1  ;;  %687 = vrot.lane.b32.xlu0 %v683_v50, %s1093_s1 }
 0x1c1   :  { %v528_v51 = vpop.permute.xlu1 %527  ;;  %v209_v52 = vpop.permute.xlu0 %208 }
 0x1c2   :  { %530 = vst.msk [vmem:[#allocation5 + $0x8] sm:$0xff] %vm211_vm3, %v528_v51  ;;  %212 = vst.msk [vmem:[#allocation5] sm:$0xff] %vm211_vm3, %v209_v52 }
 0x1c5   :  { %v290_v53 = vpop.permute.xlu1 %289  ;;  %v608_v54 = vpop.permute.xlu0 %607 }
 0x1c6   :  { %293 = vst.msk [vmem:[#allocation5] sm:$0xff] %vm292_vm4, %v290_v53  ;;  %610 = vst.msk [vmem:[#allocation5 + $0x8] sm:$0xff] %vm292_vm4, %v608_v54 }
 0x1c9   :  { %v371_v55 = vpop.permute.xlu1 %370  ;;  %v688_v56 = vpop.permute.xlu0 %687 }
 0x1ca   :  { %374 = vst.msk [vmem:[#allocation5] sm:$0xff] %vm373_vm5, %v371_v55  ;;  %690 = vst.msk [vmem:[#allocation5 + $0x8] sm:$0xff] %vm373_vm5, %v688_v56 }
 0x1cb   :  { %1077 = shalt.err (!%p1074_p9)
}
 0x1cc   :  { %776 = dma.vmem_to_hbm [thread:$0]  %s774_s2, 384, %s1382_s5, [#allocation4]  }
 0x1cd   :  { %1088 = dma.done.wait [#allocation4], 384  }
 0x1ce   :  { %1089 = vsyncadd [#allocation4], 4294966912 }
 0x1cf   :  { %780 = vsyncpa [#allocation3], 1 }
 0x1d0   :  { %781 = vsyncpa [#allocation4], 1 }

</bundles_post_ra>
